<compile_context>
chip_gen: v6e
topology: v6e:2x2x1
jax: 0.10.0
libtpu: 0.0.40
codegen_flags: <defaults>
</compile_context>

<pallas_src>
import functools

import jax
import jax.numpy as jnp
from jax.experimental import pallas as pl
from jax.experimental.pallas import tpu as pltpu

LANE = 128      # TPU lane width: hidden dim padded to a multiple of this
SUBLANE = 16    # batch-tile granularity (covers bf16 sublane packing; fine for f32)

_single_buffer_weights_ok = [True]   # flipped off if pl.Buffered(1) is rejected


def _round_up(n, m):
    return ((n + m - 1) // m) * m


def _vmem_capacity_bytes():
    """Physical VMEM per core, with a conservative fallback (v7x: 64 MiB)."""
    try:
        cap = int(pltpu.get_tpu_info().vmem_capacity_bytes)
        if cap > 0:
            return cap
    except Exception:
        pass
    return 64 << 20


# --------------------------------------------------------------------------
# Fused kernel: whole MLP per batch tile, weights resident in VMEM.
# --------------------------------------------------------------------------
def mlp_kernel(x_ref, w1_ref, b1_ref, w2_ref, b2_ref, w3_ref, b3_ref, o_ref):
    """One batch tile: three MXU matmuls with f32 accumulation + f32 epilogue."""
    cdt = w1_ref.dtype  # matmul operand dtype (bf16 by default, f32 optional)

    # Layer 1: Linear + ReLU (x cast to matmul dtype in-kernel; no wrapper cast)
    h = jnp.dot(x_ref[...].astype(cdt), w1_ref[...],
                preferred_element_type=jnp.float32)
    h = jnp.maximum(h + b1_ref[...], 0.0)

    # Layer 2: Linear + ReLU
    h = jnp.dot(h.astype(cdt), w2_ref[...], preferred_element_type=jnp.float32)
    h = jnp.maximum(h + b2_ref[...], 0.0)

    # Layer 3: Linear + Sigmoid
    h = jnp.dot(h.astype(cdt), w3_ref[...], preferred_element_type=jnp.float32)
    o_ref[...] = jax.nn.sigmoid(h + b3_ref[...]).astype(o_ref.dtype)


# --------------------------------------------------------------------------
# Per-layer kernel: fallback when the full weight set does not fit VMEM.
# --------------------------------------------------------------------------
def _linear_act_kernel(x_ref, w_ref, b_ref, o_ref, *, act):
    h = jnp.dot(x_ref[...].astype(w_ref.dtype), w_ref[...],
                preferred_element_type=jnp.float32)
    h = h + b_ref[...]
    if act == "relu":
        h = jnp.maximum(h, 0.0)
    elif act == "sigmoid":
        h = jax.nn.sigmoid(h)
    o_ref[...] = h.astype(o_ref.dtype)


# --------------------------------------------------------------------------
# Parameter prep: transpose to [in, out], pad only the hidden dim, cast.
# --------------------------------------------------------------------------
def prepare_params(params, compute_dtype=jnp.bfloat16):
    """One-time prep.  Zero-padding of the hidden dim is exact: padded weight
    columns/rows and biases are 0, so padded hidden columns are ReLU(0)=0 and
    contribute nothing downstream.  c_in and c_out are left unpadded."""
    w1, b1 = params["w1"], params["b1"]
    w2, b2 = params["w2"], params["b2"]
    w3, b3 = params["w3"], params["b3"]
    c_in, c_hid, c_out = w1.shape[1], w1.shape[0], w3.shape[0]
    chid_p = _round_up(c_hid, LANE)

    def prep_w(w, k_pad, n_pad):
        wt = w.T  # PyTorch [out, in] -> [in, out] so the kernel does x @ W
        wt = jnp.pad(wt, ((0, k_pad - wt.shape[0]), (0, n_pad - wt.shape[1])))
        return wt.astype(compute_dtype)

    def prep_b(b, n_pad):
        return jnp.pad(b, (0, n_pad - b.shape[0]))[None, :].astype(jnp.float32)

    return {
        "w1": prep_w(w1, c_in, chid_p),   "b1": prep_b(b1, chid_p),
        "w2": prep_w(w2, chid_p, chid_p), "b2": prep_b(b2, chid_p),
        "w3": prep_w(w3, chid_p, c_out),  "b3": prep_b(b3, c_out),
        "c_in": c_in, "c_hid": c_hid, "c_out": c_out, "chid_p": chid_p,
        "compute_dtype": jnp.dtype(compute_dtype),
    }


# --------------------------------------------------------------------------
# VMEM footprint estimates.
# --------------------------------------------------------------------------
def _fused_vmem_bytes(tile_b, c_in, chid_p, c_out, x_isz, w_isz, weight_bufs):
    x_tile = tile_b * c_in * x_isz
    o_tile = tile_b * c_out * 4
    weights = (c_in * chid_p + chid_p * chid_p + chid_p * c_out) * w_isz
    biases = (2 * chid_p + c_out) * 4
    inter = 2 * tile_b * chid_p * 4 + 2 * tile_b * chid_p * w_isz  # f32 h + casts
    # x/out are double-buffered by the pipeline; weights/biases use weight_bufs.
    return 2 * (x_tile + o_tile) + weight_bufs * (weights + biases) + inter


def _layer_vmem_bytes(tile_m, k, tn, x_isz, w_isz, o_isz):
    io = 2 * (tile_m * k * x_isz + tile_m * tn * o_isz)   # double-buffered x/out
    wb = 2 * (k * tn * w_isz + tn * 4)                    # weight/bias tiles
    tmp = tile_m * tn * 4 + tile_m * k * w_isz            # f32 acc + cast copy
    return io + wb + tmp


def _pick_tile_n(n):
    for tn in (512, 256, 128):
        if n % tn == 0:
            return tn
    return n


# --------------------------------------------------------------------------
# Fused-path pallas_call (with guarded single-buffered resident weights).
# --------------------------------------------------------------------------
def _mlp_fused(x_in, prep, tile_b, n_tiles, budget):
    c_in, chid_p, c_out = prep["c_in"], prep["chid_p"], prep["c_out"]
    w_isz = prep["compute_dtype"].itemsize
    x_isz = x_in.dtype.itemsize
    batch_p = x_in.shape[0]

    def run(single_buffer):
        bufs = 1 if single_buffer else 2
        est = _fused_vmem_bytes(tile_b, c_in, chid_p, c_out, x_isz, w_isz, bufs)
        vmem_limit = int(min(budget, max(8 << 20, int(est * 1.3))))

        tiled = lambda cols: pl.BlockSpec((tile_b, cols), lambda i: (i, 0))
        if single_buffer:
            # Constant index_map -> data never changes; single-buffer to halve
            # the resident weight/bias VMEM footprint.
            resident = lambda a: pl.BlockSpec(a.shape, lambda i: (0,) * a.ndim,
                                              pipeline_mode=pl.Buffered(1))
        else:
            resident = lambda a: pl.BlockSpec(a.shape, lambda i: (0,) * a.ndim)

        return pl.pallas_call(
            mlp_kernel,
            out_shape=jax.ShapeDtypeStruct((batch_p, c_out), jnp.float32),
            grid=(n_tiles,),
            in_specs=[tiled(c_in),
                      resident(prep["w1"]), resident(prep["b1"]),
                      resident(prep["w2"]), resident(prep["b2"]),
                      resident(prep["w3"]), resident(prep["b3"])],
            out_specs=tiled(c_out),
            compiler_params=pltpu.CompilerParams(
                dimension_semantics=("parallel",),   # megacore sharding on v7x
                vmem_limit_bytes=vmem_limit),
        )(x_in, prep["w1"], prep["b1"], prep["w2"], prep["b2"],
          prep["w3"], prep["b3"])

    if _single_buffer_weights_ok[0]:
        try:
            return jax.block_until_ready(run(True))
        except Exception:
            _single_buffer_weights_ok[0] = False   # fall back to default buffering
    return run(False)


# --------------------------------------------------------------------------
# Split-path (per-layer) fallback for weight sets too large for VMEM.
# --------------------------------------------------------------------------
def _linear_act(x, w, b, act, out_dtype, tile_m, budget):
    m, k = x.shape
    n = w.shape[1]
    tn = _pick_tile_n(n)
    est = _layer_vmem_bytes(tile_m, k, tn, x.dtype.itemsize, w.dtype.itemsize,
                            jnp.dtype(out_dtype).itemsize)
    vmem_limit = int(min(budget, max(8 << 20, int(est * 1.3))))
    # TODO(synk): if a single (tile_m, K) x-tile / (K, tn) weight-tile still
    # overflows VMEM (extremely large c_hid), add a K reduction grid axis with
    # an f32 accumulator (pl.when init/finalize).
    return pl.pallas_call(
        functools.partial(_linear_act_kernel, act=act),
        out_shape=jax.ShapeDtypeStruct((m, n), out_dtype),
        grid=(m // tile_m, n // tn),
        in_specs=[pl.BlockSpec((tile_m, k), lambda i, j: (i, 0)),
                  pl.BlockSpec((k, tn), lambda i, j: (0, j)),
                  pl.BlockSpec((1, tn), lambda i, j: (0, j))],
        out_specs=pl.BlockSpec((tile_m, tn), lambda i, j: (i, j)),
        compiler_params=pltpu.CompilerParams(
            dimension_semantics=("parallel", "parallel"),
            vmem_limit_bytes=vmem_limit),
    )(x, w, b)


def _mlp_split(x_in, prep, tile_m, budget):
    cdt = prep["compute_dtype"]
    h = _linear_act(x_in, prep["w1"], prep["b1"], "relu", cdt, tile_m, budget)
    h = _linear_act(h, prep["w2"], prep["b2"], "relu", cdt, tile_m, budget)
    return _linear_act(h, prep["w3"], prep["b3"], "sigmoid", jnp.float32,
                       tile_m, budget)


# --------------------------------------------------------------------------
# Forward wrapper.
# --------------------------------------------------------------------------
def mlp_forward(x, prep, tile_b=None, force_split=False):
    """x: [batch, c_in] float32; prep: output of prepare_params."""
    c_in, chid_p, c_out = prep["c_in"], prep["chid_p"], prep["c_out"]
    w_isz = prep["compute_dtype"].itemsize
    x_isz = x.dtype.itemsize
    batch = x.shape[0]

    cap = _vmem_capacity_bytes()
    budget = (cap * 3) // 4          # ~48 MiB on v7x (64 MiB), ~96 MiB on v5e/v6e

    weights_bytes = ((c_in * chid_p + chid_p * chid_p + chid_p * c_out) * w_isz
                     + (2 * chid_p + c_out) * 4)
    use_split = force_split or (weights_bytes > budget // 2)

    # --- batch tile: large (amortize ~0.35us/step), multiple of SUBLANE,
    #     capped so v7x's two TensorCores both get work, sized against VMEM.
    if tile_b is None:
        tile_b = 1024
    tile_b = max(SUBLANE, _round_up(int(tile_b), SUBLANE))
    tile_b = min(tile_b, _round_up(batch, SUBLANE))
    if batch > SUBLANE:
        tile_b = min(tile_b, _round_up(pl.cdiv(batch, 2), SUBLANE))  # >=2 grid steps

    if not use_split:
        while (tile_b > SUBLANE and
               _fused_vmem_bytes(tile_b, c_in, chid_p, c_out, x_isz, w_isz, 1)
               > budget):
            tile_b = max(SUBLANE, _round_up(tile_b // 2, SUBLANE))
    else:
        tn_mid = _pick_tile_n(chid_p)
        while (tile_b > SUBLANE and
               _layer_vmem_bytes(tile_b, chid_p, tn_mid, w_isz, w_isz, w_isz)
               > budget):
            tile_b = max(SUBLANE, _round_up(tile_b // 2, SUBLANE))

    # --- pad batch only when needed; x stays in its original dtype (cast is
    #     done in-kernel), and c_in / c_out are never padded.
    batch_p = _round_up(batch, tile_b)
    x_in = x if batch_p == batch else jnp.pad(x, ((0, batch_p - batch), (0, 0)))
    n_tiles = batch_p // tile_b

    if use_split:
        out_p = _mlp_split(x_in, prep, tile_b, budget)
    else:
        out_p = _mlp_fused(x_in, prep, tile_b, n_tiles, budget)

    return out_p if batch_p == batch else out_p[:batch]


# --------------------------------------------------------------------------
# Init / reference / self-test.
# --------------------------------------------------------------------------
def init_params(key, c_in, c_hid, c_out):
    """Deterministic init mimicking nn.Linear default (uniform +/- 1/sqrt(fan_in))."""
    ks = jax.random.split(key, 6)

    def linear_init(kw, kb, fan_in, fan_out):
        bound = 1.0 / jnp.sqrt(fan_in)
        w = jax.random.uniform(kw, (fan_out, fan_in), jnp.float32, -bound, bound)
        b = jax.random.uniform(kb, (fan_out,), jnp.float32, -bound, bound)
        return w, b

    w1, b1 = linear_init(ks[0], ks[1], c_in, c_hid)
    w2, b2 = linear_init(ks[2], ks[3], c_hid, c_hid)
    w3, b3 = linear_init(ks[4], ks[5], c_hid, c_out)
    return {"w1": w1, "b1": b1, "w2": w2, "b2": b2, "w3": w3, "b3": b3}


def mlp_reference(x, params):
    """Pure-JAX reference matching the PyTorch forward exactly (f32)."""
    h = jax.nn.relu(x @ params["w1"].T + params["b1"])
    h = jax.nn.relu(h @ params["w2"].T + params["b2"])
    return jax.nn.sigmoid(h @ params["w3"].T + params["b3"])


if __name__ == "__main__":
    key = jax.random.PRNGKey(0)
    k_x, k_p = jax.random.split(key)

    batch, c_in, c_hid, c_out = 20, 16, 32, 8
    x = jax.random.normal(k_x, (batch, c_in), jnp.float32)
    params = init_params(k_p, c_in, c_hid, c_out)
    ref = mlp_reference(x, params)

    # f32 compute path: tight tolerance; batch 20 -> 2 tiles of 16 (multi-step grid).
    prep_f32 = prepare_params(params, jnp.float32)
    out_f32 = jax.block_until_ready(mlp_forward(x, prep_f32, tile_b=16))
    assert out_f32.shape == (batch, c_out), out_f32.shape
    assert jnp.allclose(out_f32, ref, atol=1e-5, rtol=1e-5), float(
        jnp.max(jnp.abs(out_f32 - ref)))

    # Default bf16-operand path (f32 accumulation + f32 epilogue) — now the
    # default on all generations (v5e included).
    prep_bf16 = prepare_params(params)
    out_bf16 = jax.block_until_ready(mlp_forward(x, prep_bf16))
    assert out_bf16.shape == (batch, c_out), out_bf16.shape
    assert jnp.allclose(out_bf16, ref, atol=3e-2, rtol=3e-2), float(
        jnp.max(jnp.abs(out_bf16 - ref)))

    # Per-layer fallback path (auto-selected when the weight set would not fit
    # VMEM, e.g. very large c_hid on v7x); exercised here explicitly.
    out_split = jax.block_until_ready(mlp_forward(x, prep_bf16, force_split=True))
    assert out_split.shape == (batch, c_out), out_split.shape
    assert jnp.allclose(out_split, ref, atol=3e-2, rtol=3e-2), float(
        jnp.max(jnp.abs(out_split - ref)))

    print("KERNEL_OK")
</pallas_src>

<mosaic_0001>
module attributes {stable_mosaic.version = 11 : i64} {
  func.func @mlp_kernel(%arg0: i32, %arg1: memref<16x16xf32, #tpu.memory_space<vmem>>, %arg2: memref<16x128xf32, #tpu.memory_space<vmem>>, %arg3: memref<1x128xf32, #tpu.memory_space<vmem>>, %arg4: memref<128x128xf32, #tpu.memory_space<vmem>>, %arg5: memref<1x128xf32, #tpu.memory_space<vmem>>, %arg6: memref<128x8xf32, #tpu.memory_space<vmem>>, %arg7: memref<1x8xf32, #tpu.memory_space<vmem>>, %arg8: memref<16x8xf32, #tpu.memory_space<vmem>>) attributes {dimension_semantics = [#tpu.dimension_semantics<parallel>], iteration_bounds = array<i64: 2>, scalar_prefetch = 0 : i64, scratch_operands = 0 : i64, tpu.core_type = #tpu.core_type<tc>, window_params = [{transform_indices = @transform_0, window_bounds = array<i64: 16, 16>}, {pipeline_mode = #tpu.pipeline_mode<synchronous>, transform_indices = @transform_1, window_bounds = array<i64: 16, 128>}, {pipeline_mode = #tpu.pipeline_mode<synchronous>, transform_indices = @transform_2, window_bounds = array<i64: 1, 128>}, {pipeline_mode = #tpu.pipeline_mode<synchronous>, transform_indices = @transform_3, window_bounds = array<i64: 128, 128>}, {pipeline_mode = #tpu.pipeline_mode<synchronous>, transform_indices = @transform_4, window_bounds = array<i64: 1, 128>}, {pipeline_mode = #tpu.pipeline_mode<synchronous>, transform_indices = @transform_5, window_bounds = array<i64: 128, 8>}, {pipeline_mode = #tpu.pipeline_mode<synchronous>, transform_indices = @transform_6, window_bounds = array<i64: 1, 8>}, {transform_indices = @transform_7, window_bounds = array<i64: 16, 8>}]} {
    %c0 = arith.constant 0 : index
    %c0_0 = arith.constant 0 : index
    %0 = vector.load %arg1[%c0, %c0_0] : memref<16x16xf32, #tpu.memory_space<vmem>>, vector<16x16xf32>
    %c0_1 = arith.constant 0 : index
    %c0_2 = arith.constant 0 : index
    %1 = vector.load %arg2[%c0_1, %c0_2] : memref<16x128xf32, #tpu.memory_space<vmem>>, vector<16x128xf32>
    %cst = arith.constant dense<0.000000e+00> : vector<16x128xf32>
    %2 = tpu.matmul %0, %1, %cst {dimension_numbers = #tpu.dot_dimension_numbers<[1], [0], [0], [1], [0, 0, 1, 1], [], []>} : vector<16x16xf32>, vector<16x128xf32>, vector<16x128xf32> -> vector<16x128xf32>
    %c0_3 = arith.constant 0 : index
    %c0_4 = arith.constant 0 : index
    %3 = vector.load %arg3[%c0_3, %c0_4] : memref<1x128xf32, #tpu.memory_space<vmem>>, vector<1x128xf32>
    %4 = vector.broadcast %3 : vector<1x128xf32> to vector<16x128xf32>
    %5 = arith.addf %2, %4 : vector<16x128xf32>
    %cst_5 = arith.constant 0.000000e+00 : f32
    %6 = vector.broadcast %cst_5 : f32 to vector<16x128xf32>
    %7 = arith.maximumf %5, %6 : vector<16x128xf32>
    %c0_6 = arith.constant 0 : index
    %c0_7 = arith.constant 0 : index
    %8 = vector.load %arg4[%c0_6, %c0_7] : memref<128x128xf32, #tpu.memory_space<vmem>>, vector<128x128xf32>
    %cst_8 = arith.constant dense<0.000000e+00> : vector<16x128xf32>
    %9 = tpu.matmul %7, %8, %cst_8 {dimension_numbers = #tpu.dot_dimension_numbers<[1], [0], [0], [1], [0, 0, 1, 1], [], []>} : vector<16x128xf32>, vector<128x128xf32>, vector<16x128xf32> -> vector<16x128xf32>
    %c0_9 = arith.constant 0 : index
    %c0_10 = arith.constant 0 : index
    %10 = vector.load %arg5[%c0_9, %c0_10] : memref<1x128xf32, #tpu.memory_space<vmem>>, vector<1x128xf32>
    %11 = vector.broadcast %10 : vector<1x128xf32> to vector<16x128xf32>
    %12 = arith.addf %9, %11 : vector<16x128xf32>
    %cst_11 = arith.constant 0.000000e+00 : f32
    %13 = vector.broadcast %cst_11 : f32 to vector<16x128xf32>
    %14 = arith.maximumf %12, %13 : vector<16x128xf32>
    %c0_12 = arith.constant 0 : index
    %c0_13 = arith.constant 0 : index
    %15 = vector.load %arg6[%c0_12, %c0_13] : memref<128x8xf32, #tpu.memory_space<vmem>>, vector<128x8xf32>
    %cst_14 = arith.constant dense<0.000000e+00> : vector<16x8xf32>
    %16 = tpu.matmul %14, %15, %cst_14 {dimension_numbers = #tpu.dot_dimension_numbers<[1], [0], [0], [1], [0, 0, 1, 1], [], []>} : vector<16x128xf32>, vector<128x8xf32>, vector<16x8xf32> -> vector<16x8xf32>
    %c0_15 = arith.constant 0 : index
    %c0_16 = arith.constant 0 : index
    %17 = vector.load %arg7[%c0_15, %c0_16] : memref<1x8xf32, #tpu.memory_space<vmem>>, vector<1x8xf32>
    %18 = vector.broadcast %17 : vector<1x8xf32> to vector<16x8xf32>
    %19 = arith.addf %16, %18 : vector<16x8xf32>
    %20 = arith.negf %19 : vector<16x8xf32>
    %21 = math.exp %20 : vector<16x8xf32>
    %cst_17 = arith.constant 1.000000e+00 : f32
    %22 = vector.broadcast %cst_17 : f32 to vector<16x8xf32>
    %23 = arith.addf %22, %21 : vector<16x8xf32>
    %24 = arith.divf %22, %23 : vector<16x8xf32>
    %c0_18 = arith.constant 0 : index
    %c0_19 = arith.constant 0 : index
    %25 = vector.load %arg8[%c0_18, %c0_19] : memref<16x8xf32, #tpu.memory_space<vmem>>, vector<16x8xf32>
    tpu.vector_store %arg8[%c0_18, %c0_19], %24 {strides = array<i32>} : memref<16x8xf32, #tpu.memory_space<vmem>>, vector<16x8xf32>,
    return
  }
  func.func @transform_0(%arg0: i32) -> (i32, i32) {
    %c0_i32 = arith.constant 0 : i32
    %c0_i32_0 = arith.constant 0 : i32
    return %arg0, %c0_i32 : i32, i32
  }
  func.func @transform_1(%arg0: i32) -> (i32, i32) {
    %c0_i32 = arith.constant 0 : i32
    %c0_i32_0 = arith.constant 0 : i32
    %c0_i32_1 = arith.constant 0 : i32
    return %c0_i32, %c0_i32_0 : i32, i32
  }
  func.func @transform_2(%arg0: i32) -> (i32, i32) {
    %c0_i32 = arith.constant 0 : i32
    %c0_i32_0 = arith.constant 0 : i32
    %c0_i32_1 = arith.constant 0 : i32
    return %c0_i32, %c0_i32_0 : i32, i32
  }
  func.func @transform_3(%arg0: i32) -> (i32, i32) {
    %c0_i32 = arith.constant 0 : i32
    %c0_i32_0 = arith.constant 0 : i32
    %c0_i32_1 = arith.constant 0 : i32
    return %c0_i32, %c0_i32_0 : i32, i32
  }
  func.func @transform_4(%arg0: i32) -> (i32, i32) {
    %c0_i32 = arith.constant 0 : i32
    %c0_i32_0 = arith.constant 0 : i32
    %c0_i32_1 = arith.constant 0 : i32
    return %c0_i32, %c0_i32_0 : i32, i32
  }
  func.func @transform_5(%arg0: i32) -> (i32, i32) {
    %c0_i32 = arith.constant 0 : i32
    %c0_i32_0 = arith.constant 0 : i32
    %c0_i32_1 = arith.constant 0 : i32
    return %c0_i32, %c0_i32_0 : i32, i32
  }
  func.func @transform_6(%arg0: i32) -> (i32, i32) {
    %c0_i32 = arith.constant 0 : i32
    %c0_i32_0 = arith.constant 0 : i32
    %c0_i32_1 = arith.constant 0 : i32
    return %c0_i32, %c0_i32_0 : i32, i32
  }
  func.func @transform_7(%arg0: i32) -> (i32, i32) {
    %c0_i32 = arith.constant 0 : i32
    %c0_i32_0 = arith.constant 0 : i32
    return %arg0, %c0_i32 : i32, i32
  }
}

module attributes {stable_mosaic.version = 11 : i64} {
  func.func @mlp_kernel(%arg0: i32, %arg1: memref<16x16xf32, #tpu.memory_space<vmem>>, %arg2: memref<16x128xf32, #tpu.memory_space<vmem>>, %arg3: memref<1x128xf32, #tpu.memory_space<vmem>>, %arg4: memref<128x128xf32, #tpu.memory_space<vmem>>, %arg5: memref<1x128xf32, #tpu.memory_space<vmem>>, %arg6: memref<128x8xf32, #tpu.memory_space<vmem>>, %arg7: memref<1x8xf32, #tpu.memory_space<vmem>>, %arg8: memref<16x8xf32, #tpu.memory_space<vmem>>) attributes {dimension_semantics = [#tpu.dimension_semantics<parallel>], iteration_bounds = array<i64: 2>, scalar_prefetch = 0 : i64, scratch_operands = 0 : i64, tpu.core_type = #tpu.core_type<tc>, window_params = [{transform_indices = @transform_0, window_bounds = array<i64: 16, 16>}, {pipeline_mode = #tpu.pipeline_mode<synchronous>, transform_indices = @transform_1, window_bounds = array<i64: 16, 128>}, {pipeline_mode = #tpu.pipeline_mode<synchronous>, transform_indices = @transform_2, window_bounds = array<i64: 1, 128>}, {pipeline_mode = #tpu.pipeline_mode<synchronous>, transform_indices = @transform_3, window_bounds = array<i64: 128, 128>}, {pipeline_mode = #tpu.pipeline_mode<synchronous>, transform_indices = @transform_4, window_bounds = array<i64: 1, 128>}, {pipeline_mode = #tpu.pipeline_mode<synchronous>, transform_indices = @transform_5, window_bounds = array<i64: 128, 8>}, {pipeline_mode = #tpu.pipeline_mode<synchronous>, transform_indices = @transform_6, window_bounds = array<i64: 1, 8>}, {transform_indices = @transform_7, window_bounds = array<i64: 16, 8>}]} {
    %c0 = arith.constant 0 : index
    %c0_0 = arith.constant 0 : index
    %0 = vector.load %arg1[%c0, %c0_0] : memref<16x16xf32, #tpu.memory_space<vmem>>, vector<16x16xf32>
    %c0_1 = arith.constant 0 : index
    %c0_2 = arith.constant 0 : index
    %1 = vector.load %arg2[%c0_1, %c0_2] : memref<16x128xf32, #tpu.memory_space<vmem>>, vector<16x128xf32>
    %cst = arith.constant dense<0.000000e+00> : vector<16x128xf32>
    %2 = tpu.matmul %0, %1, %cst {dimension_numbers = #tpu.dot_dimension_numbers<[1], [0], [0], [1], [0, 0, 1, 1], [], []>} : vector<16x16xf32>, vector<16x128xf32>, vector<16x128xf32> -> vector<16x128xf32>
    %c0_3 = arith.constant 0 : index
    %c0_4 = arith.constant 0 : index
    %3 = vector.load %arg3[%c0_3, %c0_4] : memref<1x128xf32, #tpu.memory_space<vmem>>, vector<1x128xf32>
    %4 = vector.broadcast %3 : vector<1x128xf32> to vector<16x128xf32>
    %5 = arith.addf %2, %4 : vector<16x128xf32>
    %cst_5 = arith.constant 0.000000e+00 : f32
    %6 = vector.broadcast %cst_5 : f32 to vector<16x128xf32>
    %7 = arith.maximumf %5, %6 : vector<16x128xf32>
    %c0_6 = arith.constant 0 : index
    %c0_7 = arith.constant 0 : index
    %8 = vector.load %arg4[%c0_6, %c0_7] : memref<128x128xf32, #tpu.memory_space<vmem>>, vector<128x128xf32>
    %cst_8 = arith.constant dense<0.000000e+00> : vector<16x128xf32>
    %9 = tpu.matmul %7, %8, %cst_8 {dimension_numbers = #tpu.dot_dimension_numbers<[1], [0], [0], [1], [0, 0, 1, 1], [], []>} : vector<16x128xf32>, vector<128x128xf32>, vector<16x128xf32> -> vector<16x128xf32>
    %c0_9 = arith.constant 0 : index
    %c0_10 = arith.constant 0 : index
    %10 = vector.load %arg5[%c0_9, %c0_10] : memref<1x128xf32, #tpu.memory_space<vmem>>, vector<1x128xf32>
    %11 = vector.broadcast %10 : vector<1x128xf32> to vector<16x128xf32>
    %12 = arith.addf %9, %11 : vector<16x128xf32>
    %cst_11 = arith.constant 0.000000e+00 : f32
    %13 = vector.broadcast %cst_11 : f32 to vector<16x128xf32>
    %14 = arith.maximumf %12, %13 : vector<16x128xf32>
    %c0_12 = arith.constant 0 : index
    %c0_13 = arith.constant 0 : index
    %15 = vector.load %arg6[%c0_12, %c0_13] : memref<128x8xf32, #tpu.memory_space<vmem>>, vector<128x8xf32>
    %cst_14 = arith.constant dense<0.000000e+00> : vector<16x8xf32>
    %16 = tpu.matmul %14, %15, %cst_14 {dimension_numbers = #tpu.dot_dimension_numbers<[1], [0], [0], [1], [0, 0, 1, 1], [], []>} : vector<16x128xf32>, vector<128x8xf32>, vector<16x8xf32> -> vector<16x8xf32>
    %c0_15 = arith.constant 0 : index
    %c0_16 = arith.constant 0 : index
    %17 = vector.load %arg7[%c0_15, %c0_16] : memref<1x8xf32, #tpu.memory_space<vmem>>, vector<1x8xf32>
    %18 = vector.broadcast %17 : vector<1x8xf32> to vector<16x8xf32>
    %19 = arith.addf %16, %18 : vector<16x8xf32>
    %20 = arith.negf %19 : vector<16x8xf32>
    %21 = math.exp %20 : vector<16x8xf32>
    %cst_17 = arith.constant 1.000000e+00 : f32
    %22 = vector.broadcast %cst_17 : f32 to vector<16x8xf32>
    %23 = arith.addf %22, %21 : vector<16x8xf32>
    %24 = arith.divf %22, %23 : vector<16x8xf32>
    %c0_18 = arith.constant 0 : index
    %c0_19 = arith.constant 0 : index
    %25 = vector.load %arg8[%c0_18, %c0_19] : memref<16x8xf32, #tpu.memory_space<vmem>>, vector<16x8xf32>
    tpu.vector_store %arg8[%c0_18, %c0_19], %24 {strides = array<i32>} : memref<16x8xf32, #tpu.memory_space<vmem>>, vector<16x8xf32>,
    return
  }
  func.func @transform_0(%arg0: i32) -> (i32, i32) {
    %c0_i32 = arith.constant 0 : i32
    %c0_i32_0 = arith.constant 0 : i32
    return %arg0, %c0_i32 : i32, i32
  }
  func.func @transform_1(%arg0: i32) -> (i32, i32) {
    %c0_i32 = arith.constant 0 : i32
    %c0_i32_0 = arith.constant 0 : i32
    %c0_i32_1 = arith.constant 0 : i32
    return %c0_i32, %c0_i32_0 : i32, i32
  }
  func.func @transform_2(%arg0: i32) -> (i32, i32) {
    %c0_i32 = arith.constant 0 : i32
    %c0_i32_0 = arith.constant 0 : i32
    %c0_i32_1 = arith.constant 0 : i32
    return %c0_i32, %c0_i32_0 : i32, i32
  }
  func.func @transform_3(%arg0: i32) -> (i32, i32) {
    %c0_i32 = arith.constant 0 : i32
    %c0_i32_0 = arith.constant 0 : i32
    %c0_i32_1 = arith.constant 0 : i32
    return %c0_i32, %c0_i32_0 : i32, i32
  }
  func.func @transform_4(%arg0: i32) -> (i32, i32) {
    %c0_i32 = arith.constant 0 : i32
    %c0_i32_0 = arith.constant 0 : i32
    %c0_i32_1 = arith.constant 0 : i32
    return %c0_i32, %c0_i32_0 : i32, i32
  }
  func.func @transform_5(%arg0: i32) -> (i32, i32) {
    %c0_i32 = arith.constant 0 : i32
    %c0_i32_0 = arith.constant 0 : i32
    %c0_i32_1 = arith.constant 0 : i32
    return %c0_i32, %c0_i32_0 : i32, i32
  }
  func.func @transform_6(%arg0: i32) -> (i32, i32) {
    %c0_i32 = arith.constant 0 : i32
    %c0_i32_0 = arith.constant 0 : i32
    %c0_i32_1 = arith.constant 0 : i32
    return %c0_i32, %c0_i32_0 : i32, i32
  }
  func.func @transform_7(%arg0: i32) -> (i32, i32) {
    %c0_i32 = arith.constant 0 : i32
    %c0_i32_0 = arith.constant 0 : i32
    return %arg0, %c0_i32 : i32, i32
  }
}

</mosaic_0001>

<bundles_post_ra>
// kernel: tpu_custom_call.1
= control target key start
LH: loop header
LB: loop body
LE: loop exit
PB: predicated region body
PF: predicated region fallthrough
CT: control target
= control target key end

     0   :  { %s845_s24 = smov 0   ;;  %s980_s0 = inlined_call_operand.vmem [shape: f32[32,16], index: 0, kind: input, shape index: {}]   ;;  %s981_s1 = inlined_call_operand.vmem [shape: f32[16,128], index: 1, kind: input, shape index: {}]   ;;  %s982_s2 = inlined_call_operand.vmem [shape: f32[1,128], index: 2, kind: input, shape index: {}]   ;;  %s983_s3 = inlined_call_operand.vmem [shape: f32[128,128], index: 3, kind: input, shape index: {}]   ;;  %s984_s4 = inlined_call_operand.vmem [shape: f32[1,128], index: 4, kind: input, shape index: {}]   ;;  %s985_s5 = inlined_call_operand.vmem [shape: f32[128,8], index: 5, kind: input, shape index: {}]   ;;  %s986_s6 = inlined_call_operand.vmem [shape: f32[1,8], index: 6, kind: input, shape index: {}]   ;;  %s987_s7 = inlined_call_operand.vmem [shape: f32[32,8], index: 7, kind: output, shape index: {}]  }
   0x1 LB: > { %s646_s25 = sadd.s32 4294967295, %s803_s24   ;;  %p650_p0 = scmp.ge.s32.totalorder %s803_s24, 1  ;;  %s803_s24 = sphi %s845_s24, %s17_s24  }
   0x2   : > { %p238_p1 = scmp.lt.s32.totalorder %s803_s24, 3 }
   0x4   : > { %p239_p2 = pnand %p650_p0, %p238_p1 }
   0x5   : > { %s651_s30 = sshll.u32 (!%p239_p2), %s646_s25, 1 }
   0x6   : > { %242 = sbr.rel (%p239_p2) target bundleno = 648 (0x288), region = 48  ;;  %p271_p3 = scmp.lt.s32.totalorder (!%p239_p2), %s651_s30, 3 }
   0xb   : > { %v285_v0 = vld [vmem:[%s981_s1 + $0x8] sm:$0xff]  ;;  %v284_v1 = vld [vmem:[%s981_s1] sm:$0xff]  ;;  %v392_v2 = vld [vmem:[%s983_s3 + $0x78] sm:$0xff]  ;;  %s989_s30 = smov (!%p271_p3, %s651_s30), 3  ;;  %vm293_vm0 = vcmask 130048   ;;  %vm587_vm1 = vcmask 64512  }
   0xc   : > { %704 = vmatprep.subr.mxu0 %v285_v0  ;;  %711 = vmatprep.subr.mxu1 %v392_v2  ;;  %v391_v3 = vld [vmem:[%s983_s3 + $0x70] sm:$0xff]  ;;  %v390_v4 = vld [vmem:[%s983_s3 + $0x68] sm:$0xff]  ;;  %v389_v5 = vld [vmem:[%s983_s3 + $0x60] sm:$0xff]  ;;  %s652_s16 = sshll.u32 %s989_s30, 3 }
   0xd   : > { %705 = vmatpush3.msra.mxu0 %v285_v0  ;;  %712 = vmatpush3.msra.mxu1 %v392_v2  ;;  %s274_s19 = scalar_lea.vmem %s980_s0, %s652_s16  ;;  %v388_v6 = vld [vmem:[%s983_s3 + $0x58] sm:$0xff]  ;;  %v387_v9 = vld [vmem:[%s983_s3 + $0x50] sm:$0xff]  ;;  %v386_v10 = vld [vmem:[%s983_s3 + $0x48] sm:$0xff]  ;;  %s280_s25 = scalar_lea.vmem %s987_s7, %s652_s16 }
   0xe   : > { %706 = vmatprep.subr.mxu0 %v284_v1  ;;  %713 = vmatprep.subr.mxu1 %v391_v3  ;;  %v282_v7 = vld [vmem:[%s274_s19] sm:$0xff]  ;;  %v283_v8 = vld [vmem:[%s274_s19 + $0x8] sm:$0xff]  ;;  %v384_v12 = vld [vmem:[%s983_s3 + $0x38] sm:$0xff] }
   0xf   : > { %707 = vmatpush3.msra.mxu0 %v284_v1  ;;  %714 = vmatpush3.msra.mxu1 %v391_v3  ;;  %v385_v11 = vld [vmem:[%s983_s3 + $0x40] sm:$0xff]  ;;  %v383_v13 = vld [vmem:[%s983_s3 + $0x30] sm:$0xff]  ;;  %v382_v14 = vld [vmem:[%s983_s3 + $0x28] sm:$0xff] }
  0x10   : > { %715 = vmatprep.subr.mxu1 %v390_v4  ;;  %708 = vmatprep.mubr.msk.f32.mxu0 %vm293_vm0, %v282_v7  ;;  %v381_v15 = vld [vmem:[%s983_s3 + $0x20] sm:$0xff]  ;;  %v380_v16 = vld [vmem:[%s983_s3 + $0x18] sm:$0xff]  ;;  %v379_v17 = vld [vmem:[%s983_s3 + $0x10] sm:$0xff] }
  0x11   : > { %716 = vmatpush3.msra.mxu1 %v390_v4  ;;  %709 = vmatmul.mubr.msk.f32.vlgmr.msra.gmra.mxu0 %vm293_vm0, %v283_v8  ;;  %v378_v18 = vld [vmem:[%s983_s3 + $0x8] sm:$0xff]  ;;  %v377_v19 = vld [vmem:[%s983_s3] sm:$0xff]  ;;  %v492_v20 = vld [vmem:[%s985_s5 + $0x78] sm:$0xff] }
  0x12   : > { %717 = vmatprep.subr.mxu1 %v389_v5  ;;  %v491_v21 = vld [vmem:[%s985_s5 + $0x70] sm:$0xff]  ;;  %746 = vmatprep.subr.mxu0 %v492_v20  ;;  %v490_v22 = vld [vmem:[%s985_s5 + $0x68] sm:$0xff]  ;;  %v489_v23 = vld [vmem:[%s985_s5 + $0x60] sm:$0xff] }
  0x13   : > { %718 = vmatpush3.msra.mxu1 %v389_v5  ;;  %747 = vmatpush3.msra.mxu0 %v492_v20  ;;  %v488_v24 = vld [vmem:[%s985_s5 + $0x58] sm:$0xff]  ;;  %v487_v25 = vld [vmem:[%s985_s5 + $0x50] sm:$0xff]  ;;  %v486_v26 = vld [vmem:[%s985_s5 + $0x48] sm:$0xff] }
  0x14   : > { %719 = vmatprep.subr.mxu1 %v388_v6  ;;  %748 = vmatprep.subr.mxu0 %v491_v21  ;;  %v485_v27 = vld [vmem:[%s985_s5 + $0x40] sm:$0xff]  ;;  %v484_v28 = vld [vmem:[%s985_s5 + $0x38] sm:$0xff]  ;;  %v483_v29 = vld [vmem:[%s985_s5 + $0x30] sm:$0xff] }
  0x15   : > { %720 = vmatpush3.msra.mxu1 %v388_v6  ;;  %749 = vmatpush3.msra.mxu0 %v491_v21  ;;  %v482_v30 = vld [vmem:[%s985_s5 + $0x28] sm:$0xff]  ;;  %v481_v31 = vld [vmem:[%s985_s5 + $0x20] sm:$0xff]  ;;  %v480_v39 = vld [vmem:[%s985_s5 + $0x18] sm:$0xff] }
  0x16   : > { %721 = vmatprep.subr.mxu1 %v387_v9  ;;  %750 = vmatprep.subr.mxu0 %v490_v22  ;;  %v655_v32 = vld [vmem:[%s982_s2] ss:$0 sm:$0xff]  ;;  %v479_v40 = vld [vmem:[%s985_s5 + $0x10] sm:$0xff]  ;;  %v478_v41 = vld [vmem:[%s985_s5 + $0x8] sm:$0xff] }
  0x17   : > { %722 = vmatpush3.msra.mxu1 %v387_v9  ;;  %751 = vmatpush3.msra.mxu0 %v490_v22  ;;  %v477_v42 = vld [vmem:[%s985_s5] sm:$0xff] }
  0x18   : > { %723 = vmatprep.subr.mxu1 %v386_v10  ;;  %752 = vmatprep.subr.mxu0 %v489_v23  ;;  %v658_v43 = vld [vmem:[%s984_s4] ss:$0 sm:$0xff] }
  0x19   : > { %724 = vmatpush3.msra.mxu1 %v386_v10  ;;  %753 = vmatpush3.msra.mxu0 %v489_v23  ;;  %v659_v50 = vld [vmem:[%s986_s6] ss:$0 sm:$0xff] }
  0x1a   : > { %725 = vmatprep.subr.mxu1 %v385_v11  ;;  %754 = vmatprep.subr.mxu0 %v488_v24 }
  0x1b   : > { %726 = vmatpush3.msra.mxu1 %v385_v11  ;;  %755 = vmatpush3.msra.mxu0 %v488_v24 }
  0x1c   : > { %727 = vmatprep.subr.mxu1 %v384_v12  ;;  %756 = vmatprep.subr.mxu0 %v487_v25 }
  0x1d   : > { %728 = vmatpush3.msra.mxu1 %v384_v12  ;;  %757 = vmatpush3.msra.mxu0 %v487_v25 }
  0x1e   : > { %729 = vmatprep.subr.mxu1 %v383_v13  ;;  %758 = vmatprep.subr.mxu0 %v486_v26 }
  0x1f   : > { %730 = vmatpush3.msra.mxu1 %v383_v13  ;;  %759 = vmatpush3.msra.mxu0 %v486_v26 }
  0x20   : > { %731 = vmatprep.subr.mxu1 %v382_v14  ;;  %760 = vmatprep.subr.mxu0 %v485_v27 }
  0x21   : > { %732 = vmatpush3.msra.mxu1 %v382_v14  ;;  %761 = vmatpush3.msra.mxu0 %v485_v27 }
  0x22   : > { %733 = vmatprep.subr.mxu1 %v381_v15  ;;  %762 = vmatprep.subr.mxu0 %v484_v28 }
  0x23   : > { %734 = vmatpush3.msra.mxu1 %v381_v15  ;;  %763 = vmatpush3.msra.mxu0 %v484_v28 }
  0x24   : > { %735 = vmatprep.subr.mxu1 %v380_v16  ;;  %764 = vmatprep.subr.mxu0 %v483_v29 }
  0x25   : > { %736 = vmatpush3.msra.mxu1 %v380_v16  ;;  %765 = vmatpush3.msra.mxu0 %v483_v29 }
  0x26   : > { %737 = vmatprep.subr.mxu1 %v379_v17  ;;  %766 = vmatprep.subr.mxu0 %v482_v30 }
  0x27   : > { %738 = vmatpush3.msra.mxu1 %v379_v17  ;;  %767 = vmatpush3.msra.mxu0 %v482_v30 }
  0x28   : > { %739 = vmatprep.subr.mxu1 %v378_v18  ;;  %768 = vmatprep.subr.mxu0 %v481_v31 }
  0x29   : > { %740 = vmatpush3.msra.mxu1 %v378_v18  ;;  %769 = vmatpush3.msra.mxu0 %v481_v31 }
  0x2a   : > { %741 = vmatprep.subr.mxu1 %v377_v19  ;;  %770 = vmatprep.subr.mxu0 %v480_v39 }
  0x2b   : > { %742 = vmatpush3.msra.mxu1 %v377_v19  ;;  %771 = vmatpush3.msra.mxu0 %v480_v39 }
  0x2c   : > { %772 = vmatprep.subr.mxu0 %v479_v40 }
  0x2d   : > { %773 = vmatpush3.msra.mxu0 %v479_v40 }
  0x2e   : > { %774 = vmatprep.subr.mxu0 %v478_v41 }
  0x2f   : > { %775 = vmatpush3.msra.mxu0 %v478_v41 }
  0x30   : > { %776 = vmatprep.subr.mxu0 %v477_v42 }
  0x31   : > { %777 = vmatpush3.msra.mxu0 %v477_v42 }
  0xd1   : > { %v710_v33 = vpop.f32.mrf.mxu0 }
  0xd2   : > { %v372_v34 = vadd.f32 %v710_v33, %v655_v32 }
  0xd3   : > { %v366_v35 = vpop.f32.mrf.mxu0 }
  0xd4   : > { %v367_v36 = vadd.f32 %v655_v32, %v366_v35  ;;  %v376_v38 = vmax.f32 %v372_v34, 0.0 }
  0xd6   : > { %v375_v37 = vmax.f32 %v367_v36, 0.0 }
  0xd8   : > { %743 = vmatprep.mubr.f32.mxu1 %v375_v37 }
  0xd9   : > { %744 = vmatmul.mubr.f32.vlgmr.msra.gmra.mxu1 %v376_v38 }
 0x199   : > { %v745_v44 = vpop.f32.mrf.mxu1 }
 0x19a   : > { %v472_v45 = vadd.f32 %v745_v44, %v658_v43 }
 0x19b   : > { %v466_v46 = vpop.f32.mrf.mxu1 }
 0x19c   : > { %v467_v47 = vadd.f32 %v658_v43, %v466_v46  ;;  %v476_v49 = vmax.f32 %v472_v45, 0.0 }
 0x19e   : > { %v475_v48 = vmax.f32 %v467_v47, 0.0 }
 0x1a0   : > { %778 = vmatprep.mubr.f32.mxu0 %v475_v48 }
 0x1a1   : > { %779 = vmatmul.mubr.f32.vlgmr.msra.gmra.mxu0 %v476_v49 }
 0x261   : > { %v780_v51 = vpop.f32.mrf.mxu0 }
 0x262   : > { %v572_v52 = vadd.f32 %v780_v51, %v659_v50 }
 0x263   : > { %v566_v53 = vpop.f32.mrf.mxu0 }
 0x264   : > { %v661_v54 = vmul.f32 -1.442695, %v572_v52  ;;  %v567_v55 = vadd.f32 %v659_v50, %v566_v53 }
 0x266   : > { %789 = vpow2.f32 %v661_v54  ;;  %v660_v56 = vmul.f32 -1.442695, %v567_v55 }
 0x268   : > { %791 = vpow2.f32 %v660_v56 }
 0x273   : > { %v790_v57 = vpop.eup %789 }
 0x274   : > { %v582_v59 = vadd.f32 1.0, %v790_v57 }
 0x275   : > { %v792_v58 = vpop.eup %791 }
 0x276   : > { %v581_v60 = vadd.f32 1.0, %v792_v58 }
 0x278   : > { %793 = vrcp.f32 %v581_v60 }
 0x279   : > { %795 = vrcp.f32 %v582_v59 }
 0x285   : > { %v794_v61 = vpop.eup %793 }
 0x286   : > { %v796_v62 = vpop.eup %795  ;;  %588 = vst.msk [vmem:[%s280_s25] sm:$0xff] %vm587_vm1, %v794_v61 }
 0x287   : > { %589 = vst.msk [vmem:[%s280_s25 + $0x8] sm:$0xff] %vm587_vm1, %v796_v62 }
 0x288 PF: > { %s17_s24 = sadd.s32 1, %s803_s24  }
 0x289   : > { %p14_p4 = scmp.ge.s32.totalorder %s17_s24, 4  }
 0x28b   :  { %16 = sbr.rel (!%p14_p4) target bundleno = 1 (0x1), region = 78 }

// kernel: tpu_custom_call.1
= control target key start
LH: loop header
LB: loop body
LE: loop exit
PB: predicated region body
PF: predicated region fallthrough
CT: control target
= control target key end

     0   :  { %s845_s24 = smov 0   ;;  %s980_s0 = inlined_call_operand.vmem [shape: f32[32,16], index: 0, kind: input, shape index: {}]   ;;  %s981_s1 = inlined_call_operand.vmem [shape: f32[16,128], index: 1, kind: input, shape index: {}]   ;;  %s982_s2 = inlined_call_operand.vmem [shape: f32[1,128], index: 2, kind: input, shape index: {}]   ;;  %s983_s3 = inlined_call_operand.vmem [shape: f32[128,128], index: 3, kind: input, shape index: {}]   ;;  %s984_s4 = inlined_call_operand.vmem [shape: f32[1,128], index: 4, kind: input, shape index: {}]   ;;  %s985_s5 = inlined_call_operand.vmem [shape: f32[128,8], index: 5, kind: input, shape index: {}]   ;;  %s986_s6 = inlined_call_operand.vmem [shape: f32[1,8], index: 6, kind: input, shape index: {}]   ;;  %s987_s7 = inlined_call_operand.vmem [shape: f32[32,8], index: 7, kind: output, shape index: {}]  }
   0x1 LB: > { %s646_s25 = sadd.s32 4294967295, %s803_s24   ;;  %p650_p0 = scmp.ge.s32.totalorder %s803_s24, 1  ;;  %s803_s24 = sphi %s845_s24, %s17_s24  }
   0x2   : > { %p238_p1 = scmp.lt.s32.totalorder %s803_s24, 3 }
   0x4   : > { %p239_p2 = pnand %p650_p0, %p238_p1 }
   0x5   : > { %s651_s30 = sshll.u32 (!%p239_p2), %s646_s25, 1 }
   0x6   : > { %242 = sbr.rel (%p239_p2) target bundleno = 648 (0x288), region = 48  ;;  %p271_p3 = scmp.lt.s32.totalorder (!%p239_p2), %s651_s30, 3 }
   0xb   : > { %v285_v0 = vld [vmem:[%s981_s1 + $0x8] sm:$0xff]  ;;  %v284_v1 = vld [vmem:[%s981_s1] sm:$0xff]  ;;  %v392_v2 = vld [vmem:[%s983_s3 + $0x78] sm:$0xff]  ;;  %s989_s30 = smov (!%p271_p3, %s651_s30), 3  ;;  %vm293_vm0 = vcmask 130048   ;;  %vm587_vm1 = vcmask 64512  }
   0xc   : > { %704 = vmatprep.subr.mxu0 %v285_v0  ;;  %711 = vmatprep.subr.mxu1 %v392_v2  ;;  %v391_v3 = vld [vmem:[%s983_s3 + $0x70] sm:$0xff]  ;;  %v390_v4 = vld [vmem:[%s983_s3 + $0x68] sm:$0xff]  ;;  %v389_v5 = vld [vmem:[%s983_s3 + $0x60] sm:$0xff]  ;;  %s652_s16 = sshll.u32 %s989_s30, 3 }
   0xd   : > { %705 = vmatpush3.msra.mxu0 %v285_v0  ;;  %712 = vmatpush3.msra.mxu1 %v392_v2  ;;  %s274_s19 = scalar_lea.vmem %s980_s0, %s652_s16  ;;  %v388_v6 = vld [vmem:[%s983_s3 + $0x58] sm:$0xff]  ;;  %v387_v9 = vld [vmem:[%s983_s3 + $0x50] sm:$0xff]  ;;  %v386_v10 = vld [vmem:[%s983_s3 + $0x48] sm:$0xff]  ;;  %s280_s25 = scalar_lea.vmem %s987_s7, %s652_s16 }
   0xe   : > { %706 = vmatprep.subr.mxu0 %v284_v1  ;;  %713 = vmatprep.subr.mxu1 %v391_v3  ;;  %v282_v7 = vld [vmem:[%s274_s19] sm:$0xff]  ;;  %v283_v8 = vld [vmem:[%s274_s19 + $0x8] sm:$0xff]  ;;  %v384_v12 = vld [vmem:[%s983_s3 + $0x38] sm:$0xff] }
   0xf   : > { %707 = vmatpush3.msra.mxu0 %v284_v1  ;;  %714 = vmatpush3.msra.mxu1 %v391_v3  ;;  %v385_v11 = vld [vmem:[%s983_s3 + $0x40] sm:$0xff]  ;;  %v383_v13 = vld [vmem:[%s983_s3 + $0x30] sm:$0xff]  ;;  %v382_v14 = vld [vmem:[%s983_s3 + $0x28] sm:$0xff] }
  0x10   : > { %715 = vmatprep.subr.mxu1 %v390_v4  ;;  %708 = vmatprep.mubr.msk.f32.mxu0 %vm293_vm0, %v282_v7  ;;  %v381_v15 = vld [vmem:[%s983_s3 + $0x20] sm:$0xff]  ;;  %v380_v16 = vld [vmem:[%s983_s3 + $0x18] sm:$0xff]  ;;  %v379_v17 = vld [vmem:[%s983_s3 + $0x10] sm:$0xff] }
  0x11   : > { %716 = vmatpush3.msra.mxu1 %v390_v4  ;;  %709 = vmatmul.mubr.msk.f32.vlgmr.msra.gmra.mxu0 %vm293_vm0, %v283_v8  ;;  %v378_v18 = vld [vmem:[%s983_s3 + $0x8] sm:$0xff]  ;;  %v377_v19 = vld [vmem:[%s983_s3] sm:$0xff]  ;;  %v492_v20 = vld [vmem:[%s985_s5 + $0x78] sm:$0xff] }
  0x12   : > { %717 = vmatprep.subr.mxu1 %v389_v5  ;;  %v491_v21 = vld [vmem:[%s985_s5 + $0x70] sm:$0xff]  ;;  %746 = vmatprep.subr.mxu0 %v492_v20  ;;  %v490_v22 = vld [vmem:[%s985_s5 + $0x68] sm:$0xff]  ;;  %v489_v23 = vld [vmem:[%s985_s5 + $0x60] sm:$0xff] }
  0x13   : > { %718 = vmatpush3.msra.mxu1 %v389_v5  ;;  %747 = vmatpush3.msra.mxu0 %v492_v20  ;;  %v488_v24 = vld [vmem:[%s985_s5 + $0x58] sm:$0xff]  ;;  %v487_v25 = vld [vmem:[%s985_s5 + $0x50] sm:$0xff]  ;;  %v486_v26 = vld [vmem:[%s985_s5 + $0x48] sm:$0xff] }
  0x14   : > { %719 = vmatprep.subr.mxu1 %v388_v6  ;;  %748 = vmatprep.subr.mxu0 %v491_v21  ;;  %v485_v27 = vld [vmem:[%s985_s5 + $0x40] sm:$0xff]  ;;  %v484_v28 = vld [vmem:[%s985_s5 + $0x38] sm:$0xff]  ;;  %v483_v29 = vld [vmem:[%s985_s5 + $0x30] sm:$0xff] }
  0x15   : > { %720 = vmatpush3.msra.mxu1 %v388_v6  ;;  %749 = vmatpush3.msra.mxu0 %v491_v21  ;;  %v482_v30 = vld [vmem:[%s985_s5 + $0x28] sm:$0xff]  ;;  %v481_v31 = vld [vmem:[%s985_s5 + $0x20] sm:$0xff]  ;;  %v480_v39 = vld [vmem:[%s985_s5 + $0x18] sm:$0xff] }
  0x16   : > { %721 = vmatprep.subr.mxu1 %v387_v9  ;;  %750 = vmatprep.subr.mxu0 %v490_v22  ;;  %v655_v32 = vld [vmem:[%s982_s2] ss:$0 sm:$0xff]  ;;  %v479_v40 = vld [vmem:[%s985_s5 + $0x10] sm:$0xff]  ;;  %v478_v41 = vld [vmem:[%s985_s5 + $0x8] sm:$0xff] }
  0x17   : > { %722 = vmatpush3.msra.mxu1 %v387_v9  ;;  %751 = vmatpush3.msra.mxu0 %v490_v22  ;;  %v477_v42 = vld [vmem:[%s985_s5] sm:$0xff] }
  0x18   : > { %723 = vmatprep.subr.mxu1 %v386_v10  ;;  %752 = vmatprep.subr.mxu0 %v489_v23  ;;  %v658_v43 = vld [vmem:[%s984_s4] ss:$0 sm:$0xff] }
  0x19   : > { %724 = vmatpush3.msra.mxu1 %v386_v10  ;;  %753 = vmatpush3.msra.mxu0 %v489_v23  ;;  %v659_v50 = vld [vmem:[%s986_s6] ss:$0 sm:$0xff] }
  0x1a   : > { %725 = vmatprep.subr.mxu1 %v385_v11  ;;  %754 = vmatprep.subr.mxu0 %v488_v24 }
  0x1b   : > { %726 = vmatpush3.msra.mxu1 %v385_v11  ;;  %755 = vmatpush3.msra.mxu0 %v488_v24 }
  0x1c   : > { %727 = vmatprep.subr.mxu1 %v384_v12  ;;  %756 = vmatprep.subr.mxu0 %v487_v25 }
  0x1d   : > { %728 = vmatpush3.msra.mxu1 %v384_v12  ;;  %757 = vmatpush3.msra.mxu0 %v487_v25 }
  0x1e   : > { %729 = vmatprep.subr.mxu1 %v383_v13  ;;  %758 = vmatprep.subr.mxu0 %v486_v26 }
  0x1f   : > { %730 = vmatpush3.msra.mxu1 %v383_v13  ;;  %759 = vmatpush3.msra.mxu0 %v486_v26 }
  0x20   : > { %731 = vmatprep.subr.mxu1 %v382_v14  ;;  %760 = vmatprep.subr.mxu0 %v485_v27 }
  0x21   : > { %732 = vmatpush3.msra.mxu1 %v382_v14  ;;  %761 = vmatpush3.msra.mxu0 %v485_v27 }
  0x22   : > { %733 = vmatprep.subr.mxu1 %v381_v15  ;;  %762 = vmatprep.subr.mxu0 %v484_v28 }
  0x23   : > { %734 = vmatpush3.msra.mxu1 %v381_v15  ;;  %763 = vmatpush3.msra.mxu0 %v484_v28 }
  0x24   : > { %735 = vmatprep.subr.mxu1 %v380_v16  ;;  %764 = vmatprep.subr.mxu0 %v483_v29 }
  0x25   : > { %736 = vmatpush3.msra.mxu1 %v380_v16  ;;  %765 = vmatpush3.msra.mxu0 %v483_v29 }
  0x26   : > { %737 = vmatprep.subr.mxu1 %v379_v17  ;;  %766 = vmatprep.subr.mxu0 %v482_v30 }
  0x27   : > { %738 = vmatpush3.msra.mxu1 %v379_v17  ;;  %767 = vmatpush3.msra.mxu0 %v482_v30 }
  0x28   : > { %739 = vmatprep.subr.mxu1 %v378_v18  ;;  %768 = vmatprep.subr.mxu0 %v481_v31 }
  0x29   : > { %740 = vmatpush3.msra.mxu1 %v378_v18  ;;  %769 = vmatpush3.msra.mxu0 %v481_v31 }
  0x2a   : > { %741 = vmatprep.subr.mxu1 %v377_v19  ;;  %770 = vmatprep.subr.mxu0 %v480_v39 }
  0x2b   : > { %742 = vmatpush3.msra.mxu1 %v377_v19  ;;  %771 = vmatpush3.msra.mxu0 %v480_v39 }
  0x2c   : > { %772 = vmatprep.subr.mxu0 %v479_v40 }
  0x2d   : > { %773 = vmatpush3.msra.mxu0 %v479_v40 }
  0x2e   : > { %774 = vmatprep.subr.mxu0 %v478_v41 }
  0x2f   : > { %775 = vmatpush3.msra.mxu0 %v478_v41 }
  0x30   : > { %776 = vmatprep.subr.mxu0 %v477_v42 }
  0x31   : > { %777 = vmatpush3.msra.mxu0 %v477_v42 }
  0xd1   : > { %v710_v33 = vpop.f32.mrf.mxu0 }
  0xd2   : > { %v372_v34 = vadd.f32 %v710_v33, %v655_v32 }
  0xd3   : > { %v366_v35 = vpop.f32.mrf.mxu0 }
  0xd4   : > { %v367_v36 = vadd.f32 %v655_v32, %v366_v35  ;;  %v376_v38 = vmax.f32 %v372_v34, 0.0 }
  0xd6   : > { %v375_v37 = vmax.f32 %v367_v36, 0.0 }
  0xd8   : > { %743 = vmatprep.mubr.f32.mxu1 %v375_v37 }
  0xd9   : > { %744 = vmatmul.mubr.f32.vlgmr.msra.gmra.mxu1 %v376_v38 }
 0x199   : > { %v745_v44 = vpop.f32.mrf.mxu1 }
 0x19a   : > { %v472_v45 = vadd.f32 %v745_v44, %v658_v43 }
 0x19b   : > { %v466_v46 = vpop.f32.mrf.mxu1 }
 0x19c   : > { %v467_v47 = vadd.f32 %v658_v43, %v466_v46  ;;  %v476_v49 = vmax.f32 %v472_v45, 0.0 }
 0x19e   : > { %v475_v48 = vmax.f32 %v467_v47, 0.0 }
 0x1a0   : > { %778 = vmatprep.mubr.f32.mxu0 %v475_v48 }
 0x1a1   : > { %779 = vmatmul.mubr.f32.vlgmr.msra.gmra.mxu0 %v476_v49 }
 0x261   : > { %v780_v51 = vpop.f32.mrf.mxu0 }
 0x262   : > { %v572_v52 = vadd.f32 %v780_v51, %v659_v50 }
 0x263   : > { %v566_v53 = vpop.f32.mrf.mxu0 }
 0x264   : > { %v661_v54 = vmul.f32 -1.442695, %v572_v52  ;;  %v567_v55 = vadd.f32 %v659_v50, %v566_v53 }
 0x266   : > { %789 = vpow2.f32 %v661_v54  ;;  %v660_v56 = vmul.f32 -1.442695, %v567_v55 }
 0x268   : > { %791 = vpow2.f32 %v660_v56 }
 0x273   : > { %v790_v57 = vpop.eup %789 }
 0x274   : > { %v582_v59 = vadd.f32 1.0, %v790_v57 }
 0x275   : > { %v792_v58 = vpop.eup %791 }
 0x276   : > { %v581_v60 = vadd.f32 1.0, %v792_v58 }
 0x278   : > { %793 = vrcp.f32 %v581_v60 }
 0x279   : > { %795 = vrcp.f32 %v582_v59 }
 0x285   : > { %v794_v61 = vpop.eup %793 }
 0x286   : > { %v796_v62 = vpop.eup %795  ;;  %588 = vst.msk [vmem:[%s280_s25] sm:$0xff] %vm587_vm1, %v794_v61 }
 0x287   : > { %589 = vst.msk [vmem:[%s280_s25 + $0x8] sm:$0xff] %vm587_vm1, %v796_v62 }
 0x288 PF: > { %s17_s24 = sadd.s32 1, %s803_s24  }
 0x289   : > { %p14_p4 = scmp.ge.s32.totalorder %s17_s24, 4  }
 0x28b   :  { %16 = sbr.rel (!%p14_p4) target bundleno = 1 (0x1), region = 78 }

</bundles_post_ra>
